<compile_context>
chip_gen: v6e
topology: v6e:2x2x1
jax: 0.10.0
libtpu: 0.0.40
codegen_flags: <defaults>
</compile_context>

<pallas_src>
import functools

import jax
import jax.numpy as jnp
from jax.experimental import pallas as pl
from jax.experimental.pallas import tpu as pltpu


# ---------------------------------------------------------------------------
# Kernels
# ---------------------------------------------------------------------------

def _make_vmem_gather_kernel(rows_per_tile: int, pack: int, d_model: int,
                             unroll: int):
    """Gather from a VMEM-resident table.  Each output row packs `pack`
    consecutive tokens along the lane axis (lane-dense writeback when
    d_model < 128)."""

    def kernel(ids_ref, table_ref, out_ref):
        # ids_ref  : (1, rows_per_tile * pack) int32 in SMEM (this tile's ids)
        # table_ref: (V, D) table, resident in VMEM (same block every step)
        # out_ref  : (rows_per_tile, pack * D) lane-dense output block in VMEM
        def body(r, carry):
            for m in range(pack):                       # static unroll of pack
                idx = ids_ref[0, r * pack + m]          # scalar id from SMEM
                out_ref[r, m * d_model:(m + 1) * d_model] = table_ref[idx, :]
            return carry

        jax.lax.fori_loop(0, rows_per_tile, body, 0, unroll=unroll)

    return kernel


def _make_hbm_gather_kernel(tile_tokens: int, window: int, unroll: int):
    """Row-gather for large tables: for each token in this grid step, DMA the
    corresponding table row HBM -> output VMEM block, keeping up to `window`
    row copies in flight through a rolling ring of DMA semaphores."""

    def kernel(ids_ref, table_ref, out_ref, copy_sems):
        # ids_ref  : (1, tile_tokens) int32 in SMEM (this step's token ids)
        # table_ref: (V, D) embedding table in HBM (memory_space=pl.ANY)
        # out_ref  : (tile_tokens, D) output block in VMEM
        # copy_sems: (window,) DMA semaphores

        def start_row(j, row_id, slot):
            pltpu.make_async_copy(
                table_ref.at[row_id],        # (D,) row in HBM
                out_ref.at[j],               # (D,) row of the output block
                copy_sems.at[slot],
            ).start()

        def wait_row(slot):
            # Dummy descriptor with the same (D,) byte count as every started
            # copy; only the semaphore / byte count matter for the wait.
            pltpu.make_async_copy(
                table_ref.at[0], out_ref.at[0], copy_sems.at[slot]
            ).wait()

        # Prologue: fill the DMA window (static loop, ids at static offsets).
        for j in range(min(window, tile_tokens)):
            start_row(j, ids_ref[0, j], j)

        # Steady state: retire row j, launch row j + window on the freed slot.
        def body(j, carry):
            slot = j % window
            nxt = j + window
            # Hoist the SMEM id read above the .wait(): a DMA wait breaks SMEM
            # sst->sld forwarding, so read (bounds-clamped) before waiting.
            nxt_id = ids_ref[0, jnp.minimum(nxt, tile_tokens - 1)]
            wait_row(slot)

            @pl.when(nxt < tile_tokens)
            def _():
                start_row(nxt, nxt_id, slot)

            return carry

        jax.lax.fori_loop(0, tile_tokens, body, 0, unroll=unroll)

    return kernel


# ---------------------------------------------------------------------------
# Planning helpers
# ---------------------------------------------------------------------------

def _round_up(x: int, m: int) -> int:
    return ((x + m - 1) // m) * m


def _vmem_budget_bytes() -> int:
    """Per-core VMEM capacity; falls back to the most conservative budget
    across supported chips (v7x: 64 MiB/TensorCore; v5e/v6e: 128 MiB)."""
    try:
        return int(pltpu.get_tpu_info().vmem_capacity_bytes)
    except Exception:  # best-effort hardware query
        return 64 * 1024 * 1024


def _plan_row_tiling(n_rows: int, max_rows: int):
    """Choose (row_tile, padded_rows): row_tile divides padded_rows and is
    either a multiple of 8 (sublane granule) or covers the whole row axis.

    Preference: no padding first (a post-kernel slice costs an extra HBM pass
    over the result), then an even number of grid steps (balances v7x's two
    TensorCores; the extra ~0.35us/step is noise on 1-TC v5e/v6e), then the
    largest tile (fewer pipeline prologues / DMA-window refills)."""
    max_rows = max(8, max_rows)
    options = []
    if n_rows <= max_rows:
        options.append((n_rows, n_rows))             # single full-extent block
    t = 8
    while t <= min(max_rows, n_rows):
        if n_rows % t == 0:
            options.append((t, n_rows))
        t += 8
    if not options:                                  # ragged fallback: pad
        t = min((max_rows // 8) * 8, _round_up(n_rows, 8))
        options.append((t, _round_up(n_rows, t)))

    def score(opt):
        tile, padded = opt
        steps = padded // tile
        step_pref = 0 if steps % 2 == 0 else (1 if steps == 1 else 2)
        return (padded != n_rows, step_pref, -tile)

    return min(options, key=score)


def _pick_dma_window(row_bytes: int, tile_tokens: int) -> int:
    """Size the rolling DMA window from row bytes: keep ~512 KiB of row reads
    in flight (covers HBM latency at v7x/v6e bandwidth; more than v5e needs,
    but extra DMA semaphores are essentially free)."""
    target_in_flight = 512 * 1024
    w = (target_in_flight + row_bytes - 1) // max(row_bytes, 1)
    return max(1, min(32, max(8, w), tile_tokens))


# ---------------------------------------------------------------------------
# Wrapper
# ---------------------------------------------------------------------------

@functools.partial(jax.jit, static_argnames=("max_tile_tokens",
                                             "force_hbm_gather"))
def token_embedding(x, table, *, max_tile_tokens=2048, force_hbm_gather=False):
    """x: (B, S) integer token ids; table: (V, D). Returns (B, S, D)."""
    B, S = x.shape
    V, D = table.shape
    T = B * S
    itemsize = jnp.dtype(table.dtype).itemsize
    pad_idx = V - 1                  # padding row (zeroed at init) = safe filler

    vmem_budget = _vmem_budget_bytes()
    table_bytes = V * D * itemsize
    # Fast path when the (double-buffered) resident table leaves plenty of
    # VMEM headroom: <=16 MiB tables on v7x (64 MiB), <=32 MiB on v5e/v6e.
    use_vmem_table = (not force_hbm_gather) and (table_bytes <= vmem_budget // 4)

    # Lane-dense output packing (fast path, small d_model): 128 // D tokens
    # per output row so the out block's last dim is a full 128-lane slab.
    pack = 128 // D if (use_vmem_table and D < 128 and 128 % D == 0) else 1

    # Plan the token tiling in units of packed output rows.
    row_bytes_out = pack * D * itemsize
    out_budget = (vmem_budget - (2 * table_bytes if use_vmem_table else 0)) // 3
    max_rows = min(max(1, max_tile_tokens // pack),
                   max(8, out_budget // max(1, 2 * row_bytes_out)))
    n_rows = (T + pack - 1) // pack
    row_tile, n_rows_pad = _plan_row_tiling(n_rows, max_rows)
    tile = row_tile * pack           # tokens per grid step
    T_pad = n_rows_pad * pack
    num_tiles = n_rows_pad // row_tile

    # PyTorch raises on out-of-range ids; we clamp so the gather/DMA always
    # stays in bounds.
    # TODO(synk): no cheap in-kernel equivalent of torch's index-range error.
    ids = jnp.clip(x.reshape(T).astype(jnp.int32), 0, V - 1)
    if T_pad != T:
        # Ragged fallback only (no clean tile divisor / pack remainder):
        # padded tokens gather the zero padding row and are sliced off below.
        # NOTE: the post-kernel slice costs one extra HBM pass over the result.
        ids = jnp.pad(ids, (0, T_pad - T), constant_values=pad_idx)
    ids2d = ids.reshape(num_tiles, tile)

    if use_vmem_table:
        unroll = max(1, min(8, row_tile))
        kernel = _make_vmem_gather_kernel(row_tile, pack, D, unroll)
        grid_spec = pltpu.PrefetchScalarGridSpec(
            num_scalar_prefetch=0,
            grid=(num_tiles,),
            in_specs=[
                # Per-step token ids in SMEM (scalar-indexable, no whole-array
                # scalar prefetch -> no SMEM blow-up for large B*S).
                pl.BlockSpec((1, tile), lambda t: (t, 0),
                             memory_space=pltpu.SMEM),
                # Whole table resident in VMEM (same block every step -> the
                # pipeline fetches it once and keeps it).
                pl.BlockSpec((V, D), lambda t: (0, 0)),
            ],
            out_specs=pl.BlockSpec((row_tile, pack * D), lambda t: (t, 0)),
        )
        scratch_bytes = 2 * table_bytes + 2 * row_tile * row_bytes_out
    else:
        window = _pick_dma_window(D * itemsize, tile)
        unroll = max(1, min(8, tile))
        kernel = _make_hbm_gather_kernel(tile, window, unroll)
        grid_spec = pltpu.PrefetchScalarGridSpec(
            num_scalar_prefetch=0,
            grid=(num_tiles,),
            in_specs=[
                pl.BlockSpec((1, tile), lambda t: (t, 0),
                             memory_space=pltpu.SMEM),
                pl.BlockSpec(memory_space=pl.ANY),       # table stays in HBM
            ],
            out_specs=pl.BlockSpec((tile, D), lambda t: (t, 0)),
            scratch_shapes=[pltpu.SemaphoreType.DMA((window,))],
        )
        scratch_bytes = 2 * tile * D * itemsize

    out = pl.pallas_call(
        kernel,
        out_shape=jax.ShapeDtypeStruct((n_rows_pad, pack * D), table.dtype),
        grid_spec=grid_spec,
        compiler_params=pltpu.CompilerParams(
            # Independent token tiles -> shards across v7x's 2 TensorCores.
            dimension_semantics=("parallel",),
            # Explicit scoped-VMEM budget (>= need + headroom, <= chip VMEM).
            vmem_limit_bytes=int(min(vmem_budget,
                                     max(32 << 20,
                                         scratch_bytes + (16 << 20)))),
        ),
    )(ids2d, table)

    out = out.reshape(T_pad, D)
    if T_pad != T:
        out = out[:T]
    return out.reshape(B, S, D)


def init_token_embedding_params(key, num_item, d_model):
    """nn.Embedding(num_item + 1, d_model, padding_idx=num_item): N(0,1) init,
    padding row zeroed (forward parity with PyTorch)."""
    V = num_item + 1
    table = jax.random.normal(key, (V, d_model), dtype=jnp.float32)
    table = table.at[num_item].set(0.0)
    # TODO(synk): forward-only; training parity for padding_idx (blocked
    # gradient into the padding row) would need a custom_vjp mask.
    return table


if __name__ == "__main__":
    num_item = 15          # vocabulary size (V = num_item + 1 = 16)
    d_model = 32
    B, S = 2, 8

    key = jax.random.PRNGKey(0)
    k_tab, k_idx = jax.random.split(key)

    table = init_token_embedding_params(k_tab, num_item, d_model)
    # Indices in [0, num_item]; include the padding index explicitly.
    x = jax.random.randint(k_idx, (B, S), 0, num_item + 1, dtype=jnp.int32)
    x = x.at[0, 0].set(num_item)   # exercise the padding_idx row

    # Reference: plain gather.
    ref = jnp.take(table, x, axis=0)

    # Fast path: small table -> VMEM-resident gather (the default here).
    out_fast = jax.block_until_ready(token_embedding(x, table))
    assert out_fast.shape == (B, S, d_model), out_fast.shape
    assert jnp.array_equal(out_fast, ref), "fast path mismatch vs reference"
    assert jnp.all(out_fast[0, 0] == 0.0), "padding_idx row must be zero"

    # Large-table path (forced): per-row HBM DMA gather with a rolling window.
    out_hbm = jax.block_until_ready(
        token_embedding(x, table, force_hbm_gather=True))
    assert jnp.array_equal(out_hbm, ref), "HBM-gather path mismatch"

    print("KERNEL_OK")
</pallas_src>

<mosaic_0001>
module attributes {stable_mosaic.version = 11 : i64} {
  func.func @kernel(%arg0: i32, %arg1: memref<1x16xi32, #tpu.memory_space<smem>>, %arg2: memref<16x32xf32, #tpu.memory_space<vmem>>, %arg3: memref<4x128xf32, #tpu.memory_space<vmem>>) attributes {dimension_semantics = [#tpu.dimension_semantics<parallel>], iteration_bounds = array<i64: 1>, scalar_prefetch = 0 : i64, scratch_operands = 0 : i64, tpu.core_type = #tpu.core_type<tc>, window_params = [{transform_indices = @transform_0, window_bounds = array<i64: 1, 16>}, {pipeline_mode = #tpu.pipeline_mode<synchronous>, transform_indices = @transform_1, window_bounds = array<i64: 16, 32>}, {transform_indices = @transform_2, window_bounds = array<i64: 4, 128>}]} {
    %c0_i32 = arith.constant 0 : i32
    %c4_i32 = arith.constant 4 : i32
    %0 = arith.muli %c0_i32, %c4_i32 : i32
    %c0_i32_0 = arith.constant 0 : i32
    %1 = arith.addi %0, %c0_i32_0 : i32
    %c0 = arith.constant 0 : index
    %2 = arith.index_cast %1 : i32 to index
    %3 = memref.load %arg1[%c0, %2] : memref<1x16xi32, #tpu.memory_space<smem>>
    %4 = arith.index_cast %3 : i32 to index
    %c0_1 = arith.constant 0 : index
    %5 = vector.load %arg2[%4, %c0_1] : memref<16x32xf32, #tpu.memory_space<vmem>>, vector<1x32xf32>
    %6 = vector.shape_cast %5 : vector<1x32xf32> to vector<32xf32>
    %7 = arith.index_cast %c0_i32 : i32 to index
    %c0_2 = arith.constant 0 : index
    %8 = vector.load %arg3[%7, %c0_2] : memref<4x128xf32, #tpu.memory_space<vmem>>, vector<1x32xf32>
    %9 = vector.shape_cast %8 : vector<1x32xf32> to vector<32xf32>
    %10 = vector.shape_cast %6 : vector<32xf32> to vector<1x32xf32>
    tpu.vector_store %arg3[%7, %c0_2], %10 {strides = array<i32>} : memref<4x128xf32, #tpu.memory_space<vmem>>, vector<1x32xf32>,
    %c4_i32_3 = arith.constant 4 : i32
    %11 = arith.muli %c0_i32, %c4_i32_3 : i32
    %c1_i32 = arith.constant 1 : i32
    %12 = arith.addi %11, %c1_i32 : i32
    %c0_4 = arith.constant 0 : index
    %13 = arith.index_cast %12 : i32 to index
    %14 = memref.load %arg1[%c0_4, %13] : memref<1x16xi32, #tpu.memory_space<smem>>
    %15 = arith.index_cast %14 : i32 to index
    %c0_5 = arith.constant 0 : index
    %16 = vector.load %arg2[%15, %c0_5] : memref<16x32xf32, #tpu.memory_space<vmem>>, vector<1x32xf32>
    %17 = vector.shape_cast %16 : vector<1x32xf32> to vector<32xf32>
    %18 = arith.index_cast %c0_i32 : i32 to index
    %c32 = arith.constant 32 : index
    %19 = vector.load %arg3[%18, %c32] : memref<4x128xf32, #tpu.memory_space<vmem>>, vector<1x32xf32>
    %20 = vector.shape_cast %19 : vector<1x32xf32> to vector<32xf32>
    %21 = vector.shape_cast %17 : vector<32xf32> to vector<1x32xf32>
    tpu.vector_store %arg3[%18, %c32], %21 {strides = array<i32>} : memref<4x128xf32, #tpu.memory_space<vmem>>, vector<1x32xf32>,
    %c4_i32_6 = arith.constant 4 : i32
    %22 = arith.muli %c0_i32, %c4_i32_6 : i32
    %c2_i32 = arith.constant 2 : i32
    %23 = arith.addi %22, %c2_i32 : i32
    %c0_7 = arith.constant 0 : index
    %24 = arith.index_cast %23 : i32 to index
    %25 = memref.load %arg1[%c0_7, %24] : memref<1x16xi32, #tpu.memory_space<smem>>
    %26 = arith.index_cast %25 : i32 to index
    %c0_8 = arith.constant 0 : index
    %27 = vector.load %arg2[%26, %c0_8] : memref<16x32xf32, #tpu.memory_space<vmem>>, vector<1x32xf32>
    %28 = vector.shape_cast %27 : vector<1x32xf32> to vector<32xf32>
    %29 = arith.index_cast %c0_i32 : i32 to index
    %c64 = arith.constant 64 : index
    %30 = vector.load %arg3[%29, %c64] : memref<4x128xf32, #tpu.memory_space<vmem>>, vector<1x32xf32>
    %31 = vector.shape_cast %30 : vector<1x32xf32> to vector<32xf32>
    %32 = vector.shape_cast %28 : vector<32xf32> to vector<1x32xf32>
    tpu.vector_store %arg3[%29, %c64], %32 {strides = array<i32>} : memref<4x128xf32, #tpu.memory_space<vmem>>, vector<1x32xf32>,
    %c4_i32_9 = arith.constant 4 : i32
    %33 = arith.muli %c0_i32, %c4_i32_9 : i32
    %c3_i32 = arith.constant 3 : i32
    %34 = arith.addi %33, %c3_i32 : i32
    %c0_10 = arith.constant 0 : index
    %35 = arith.index_cast %34 : i32 to index
    %36 = memref.load %arg1[%c0_10, %35] : memref<1x16xi32, #tpu.memory_space<smem>>
    %37 = arith.index_cast %36 : i32 to index
    %c0_11 = arith.constant 0 : index
    %38 = vector.load %arg2[%37, %c0_11] : memref<16x32xf32, #tpu.memory_space<vmem>>, vector<1x32xf32>
    %39 = vector.shape_cast %38 : vector<1x32xf32> to vector<32xf32>
    %40 = arith.index_cast %c0_i32 : i32 to index
    %c96 = arith.constant 96 : index
    %41 = vector.load %arg3[%40, %c96] : memref<4x128xf32, #tpu.memory_space<vmem>>, vector<1x32xf32>
    %42 = vector.shape_cast %41 : vector<1x32xf32> to vector<32xf32>
    %43 = vector.shape_cast %39 : vector<32xf32> to vector<1x32xf32>
    tpu.vector_store %arg3[%40, %c96], %43 {strides = array<i32>} : memref<4x128xf32, #tpu.memory_space<vmem>>, vector<1x32xf32>,
    %c1_i32_12 = arith.constant 1 : i32
    %c4_i32_13 = arith.constant 4 : i32
    %44 = arith.muli %c1_i32_12, %c4_i32_13 : i32
    %c0_i32_14 = arith.constant 0 : i32
    %45 = arith.addi %44, %c0_i32_14 : i32
    %c0_15 = arith.constant 0 : index
    %46 = arith.index_cast %45 : i32 to index
    %47 = memref.load %arg1[%c0_15, %46] : memref<1x16xi32, #tpu.memory_space<smem>>
    %48 = arith.index_cast %47 : i32 to index
    %c0_16 = arith.constant 0 : index
    %49 = vector.load %arg2[%48, %c0_16] : memref<16x32xf32, #tpu.memory_space<vmem>>, vector<1x32xf32>
    %50 = vector.shape_cast %49 : vector<1x32xf32> to vector<32xf32>
    %51 = arith.index_cast %c1_i32_12 : i32 to index
    %c0_17 = arith.constant 0 : index
    %52 = vector.load %arg3[%51, %c0_17] : memref<4x128xf32, #tpu.memory_space<vmem>>, vector<1x32xf32>
    %53 = vector.shape_cast %52 : vector<1x32xf32> to vector<32xf32>
    %54 = vector.shape_cast %50 : vector<32xf32> to vector<1x32xf32>
    tpu.vector_store %arg3[%51, %c0_17], %54 {strides = array<i32>} : memref<4x128xf32, #tpu.memory_space<vmem>>, vector<1x32xf32>,
    %c4_i32_18 = arith.constant 4 : i32
    %55 = arith.muli %c1_i32_12, %c4_i32_18 : i32
    %c1_i32_19 = arith.constant 1 : i32
    %56 = arith.addi %55, %c1_i32_19 : i32
    %c0_20 = arith.constant 0 : index
    %57 = arith.index_cast %56 : i32 to index
    %58 = memref.load %arg1[%c0_20, %57] : memref<1x16xi32, #tpu.memory_space<smem>>
    %59 = arith.index_cast %58 : i32 to index
    %c0_21 = arith.constant 0 : index
    %60 = vector.load %arg2[%59, %c0_21] : memref<16x32xf32, #tpu.memory_space<vmem>>, vector<1x32xf32>
    %61 = vector.shape_cast %60 : vector<1x32xf32> to vector<32xf32>
    %62 = arith.index_cast %c1_i32_12 : i32 to index
    %c32_22 = arith.constant 32 : index
    %63 = vector.load %arg3[%62, %c32_22] : memref<4x128xf32, #tpu.memory_space<vmem>>, vector<1x32xf32>
    %64 = vector.shape_cast %63 : vector<1x32xf32> to vector<32xf32>
    %65 = vector.shape_cast %61 : vector<32xf32> to vector<1x32xf32>
    tpu.vector_store %arg3[%62, %c32_22], %65 {strides = array<i32>} : memref<4x128xf32, #tpu.memory_space<vmem>>, vector<1x32xf32>,
    %c4_i32_23 = arith.constant 4 : i32
    %66 = arith.muli %c1_i32_12, %c4_i32_23 : i32
    %c2_i32_24 = arith.constant 2 : i32
    %67 = arith.addi %66, %c2_i32_24 : i32
    %c0_25 = arith.constant 0 : index
    %68 = arith.index_cast %67 : i32 to index
    %69 = memref.load %arg1[%c0_25, %68] : memref<1x16xi32, #tpu.memory_space<smem>>
    %70 = arith.index_cast %69 : i32 to index
    %c0_26 = arith.constant 0 : index
    %71 = vector.load %arg2[%70, %c0_26] : memref<16x32xf32, #tpu.memory_space<vmem>>, vector<1x32xf32>
    %72 = vector.shape_cast %71 : vector<1x32xf32> to vector<32xf32>
    %73 = arith.index_cast %c1_i32_12 : i32 to index
    %c64_27 = arith.constant 64 : index
    %74 = vector.load %arg3[%73, %c64_27] : memref<4x128xf32, #tpu.memory_space<vmem>>, vector<1x32xf32>
    %75 = vector.shape_cast %74 : vector<1x32xf32> to vector<32xf32>
    %76 = vector.shape_cast %72 : vector<32xf32> to vector<1x32xf32>
    tpu.vector_store %arg3[%73, %c64_27], %76 {strides = array<i32>} : memref<4x128xf32, #tpu.memory_space<vmem>>, vector<1x32xf32>,
    %c4_i32_28 = arith.constant 4 : i32
    %77 = arith.muli %c1_i32_12, %c4_i32_28 : i32
    %c3_i32_29 = arith.constant 3 : i32
    %78 = arith.addi %77, %c3_i32_29 : i32
    %c0_30 = arith.constant 0 : index
    %79 = arith.index_cast %78 : i32 to index
    %80 = memref.load %arg1[%c0_30, %79] : memref<1x16xi32, #tpu.memory_space<smem>>
    %81 = arith.index_cast %80 : i32 to index
    %c0_31 = arith.constant 0 : index
    %82 = vector.load %arg2[%81, %c0_31] : memref<16x32xf32, #tpu.memory_space<vmem>>, vector<1x32xf32>
    %83 = vector.shape_cast %82 : vector<1x32xf32> to vector<32xf32>
    %84 = arith.index_cast %c1_i32_12 : i32 to index
    %c96_32 = arith.constant 96 : index
    %85 = vector.load %arg3[%84, %c96_32] : memref<4x128xf32, #tpu.memory_space<vmem>>, vector<1x32xf32>
    %86 = vector.shape_cast %85 : vector<1x32xf32> to vector<32xf32>
    %87 = vector.shape_cast %83 : vector<32xf32> to vector<1x32xf32>
    tpu.vector_store %arg3[%84, %c96_32], %87 {strides = array<i32>} : memref<4x128xf32, #tpu.memory_space<vmem>>, vector<1x32xf32>,
    %c2_i32_33 = arith.constant 2 : i32
    %c4_i32_34 = arith.constant 4 : i32
    %88 = arith.muli %c2_i32_33, %c4_i32_34 : i32
    %c0_i32_35 = arith.constant 0 : i32
    %89 = arith.addi %88, %c0_i32_35 : i32
    %c0_36 = arith.constant 0 : index
    %90 = arith.index_cast %89 : i32 to index
    %91 = memref.load %arg1[%c0_36, %90] : memref<1x16xi32, #tpu.memory_space<smem>>
    %92 = arith.index_cast %91 : i32 to index
    %c0_37 = arith.constant 0 : index
    %93 = vector.load %arg2[%92, %c0_37] : memref<16x32xf32, #tpu.memory_space<vmem>>, vector<1x32xf32>
    %94 = vector.shape_cast %93 : vector<1x32xf32> to vector<32xf32>
    %95 = arith.index_cast %c2_i32_33 : i32 to index
    %c0_38 = arith.constant 0 : index
    %96 = vector.load %arg3[%95, %c0_38] : memref<4x128xf32, #tpu.memory_space<vmem>>, vector<1x32xf32>
    %97 = vector.shape_cast %96 : vector<1x32xf32> to vector<32xf32>
    %98 = vector.shape_cast %94 : vector<32xf32> to vector<1x32xf32>
    tpu.vector_store %arg3[%95, %c0_38], %98 {strides = array<i32>} : memref<4x128xf32, #tpu.memory_space<vmem>>, vector<1x32xf32>,
    %c4_i32_39 = arith.constant 4 : i32
    %99 = arith.muli %c2_i32_33, %c4_i32_39 : i32
    %c1_i32_40 = arith.constant 1 : i32
    %100 = arith.addi %99, %c1_i32_40 : i32
    %c0_41 = arith.constant 0 : index
    %101 = arith.index_cast %100 : i32 to index
    %102 = memref.load %arg1[%c0_41, %101] : memref<1x16xi32, #tpu.memory_space<smem>>
    %103 = arith.index_cast %102 : i32 to index
    %c0_42 = arith.constant 0 : index
    %104 = vector.load %arg2[%103, %c0_42] : memref<16x32xf32, #tpu.memory_space<vmem>>, vector<1x32xf32>
    %105 = vector.shape_cast %104 : vector<1x32xf32> to vector<32xf32>
    %106 = arith.index_cast %c2_i32_33 : i32 to index
    %c32_43 = arith.constant 32 : index
    %107 = vector.load %arg3[%106, %c32_43] : memref<4x128xf32, #tpu.memory_space<vmem>>, vector<1x32xf32>
    %108 = vector.shape_cast %107 : vector<1x32xf32> to vector<32xf32>
    %109 = vector.shape_cast %105 : vector<32xf32> to vector<1x32xf32>
    tpu.vector_store %arg3[%106, %c32_43], %109 {strides = array<i32>} : memref<4x128xf32, #tpu.memory_space<vmem>>, vector<1x32xf32>,
    %c4_i32_44 = arith.constant 4 : i32
    %110 = arith.muli %c2_i32_33, %c4_i32_44 : i32
    %c2_i32_45 = arith.constant 2 : i32
    %111 = arith.addi %110, %c2_i32_45 : i32
    %c0_46 = arith.constant 0 : index
    %112 = arith.index_cast %111 : i32 to index
    %113 = memref.load %arg1[%c0_46, %112] : memref<1x16xi32, #tpu.memory_space<smem>>
    %114 = arith.index_cast %113 : i32 to index
    %c0_47 = arith.constant 0 : index
    %115 = vector.load %arg2[%114, %c0_47] : memref<16x32xf32, #tpu.memory_space<vmem>>, vector<1x32xf32>
    %116 = vector.shape_cast %115 : vector<1x32xf32> to vector<32xf32>
    %117 = arith.index_cast %c2_i32_33 : i32 to index
    %c64_48 = arith.constant 64 : index
    %118 = vector.load %arg3[%117, %c64_48] : memref<4x128xf32, #tpu.memory_space<vmem>>, vector<1x32xf32>
    %119 = vector.shape_cast %118 : vector<1x32xf32> to vector<32xf32>
    %120 = vector.shape_cast %116 : vector<32xf32> to vector<1x32xf32>
    tpu.vector_store %arg3[%117, %c64_48], %120 {strides = array<i32>} : memref<4x128xf32, #tpu.memory_space<vmem>>, vector<1x32xf32>,
    %c4_i32_49 = arith.constant 4 : i32
    %121 = arith.muli %c2_i32_33, %c4_i32_49 : i32
    %c3_i32_50 = arith.constant 3 : i32
    %122 = arith.addi %121, %c3_i32_50 : i32
    %c0_51 = arith.constant 0 : index
    %123 = arith.index_cast %122 : i32 to index
    %124 = memref.load %arg1[%c0_51, %123] : memref<1x16xi32, #tpu.memory_space<smem>>
    %125 = arith.index_cast %124 : i32 to index
    %c0_52 = arith.constant 0 : index
    %126 = vector.load %arg2[%125, %c0_52] : memref<16x32xf32, #tpu.memory_space<vmem>>, vector<1x32xf32>
    %127 = vector.shape_cast %126 : vector<1x32xf32> to vector<32xf32>
    %128 = arith.index_cast %c2_i32_33 : i32 to index
    %c96_53 = arith.constant 96 : index
    %129 = vector.load %arg3[%128, %c96_53] : memref<4x128xf32, #tpu.memory_space<vmem>>, vector<1x32xf32>
    %130 = vector.shape_cast %129 : vector<1x32xf32> to vector<32xf32>
    %131 = vector.shape_cast %127 : vector<32xf32> to vector<1x32xf32>
    tpu.vector_store %arg3[%128, %c96_53], %131 {strides = array<i32>} : memref<4x128xf32, #tpu.memory_space<vmem>>, vector<1x32xf32>,
    %c3_i32_54 = arith.constant 3 : i32
    %c4_i32_55 = arith.constant 4 : i32
    %132 = arith.muli %c3_i32_54, %c4_i32_55 : i32
    %c0_i32_56 = arith.constant 0 : i32
    %133 = arith.addi %132, %c0_i32_56 : i32
    %c0_57 = arith.constant 0 : index
    %134 = arith.index_cast %133 : i32 to index
    %135 = memref.load %arg1[%c0_57, %134] : memref<1x16xi32, #tpu.memory_space<smem>>
    %136 = arith.index_cast %135 : i32 to index
    %c0_58 = arith.constant 0 : index
    %137 = vector.load %arg2[%136, %c0_58] : memref<16x32xf32, #tpu.memory_space<vmem>>, vector<1x32xf32>
    %138 = vector.shape_cast %137 : vector<1x32xf32> to vector<32xf32>
    %139 = arith.index_cast %c3_i32_54 : i32 to index
    %c0_59 = arith.constant 0 : index
    %140 = vector.load %arg3[%139, %c0_59] : memref<4x128xf32, #tpu.memory_space<vmem>>, vector<1x32xf32>
    %141 = vector.shape_cast %140 : vector<1x32xf32> to vector<32xf32>
    %142 = vector.shape_cast %138 : vector<32xf32> to vector<1x32xf32>
    tpu.vector_store %arg3[%139, %c0_59], %142 {strides = array<i32>} : memref<4x128xf32, #tpu.memory_space<vmem>>, vector<1x32xf32>,
    %c4_i32_60 = arith.constant 4 : i32
    %143 = arith.muli %c3_i32_54, %c4_i32_60 : i32
    %c1_i32_61 = arith.constant 1 : i32
    %144 = arith.addi %143, %c1_i32_61 : i32
    %c0_62 = arith.constant 0 : index
    %145 = arith.index_cast %144 : i32 to index
    %146 = memref.load %arg1[%c0_62, %145] : memref<1x16xi32, #tpu.memory_space<smem>>
    %147 = arith.index_cast %146 : i32 to index
    %c0_63 = arith.constant 0 : index
    %148 = vector.load %arg2[%147, %c0_63] : memref<16x32xf32, #tpu.memory_space<vmem>>, vector<1x32xf32>
    %149 = vector.shape_cast %148 : vector<1x32xf32> to vector<32xf32>
    %150 = arith.index_cast %c3_i32_54 : i32 to index
    %c32_64 = arith.constant 32 : index
    %151 = vector.load %arg3[%150, %c32_64] : memref<4x128xf32, #tpu.memory_space<vmem>>, vector<1x32xf32>
    %152 = vector.shape_cast %151 : vector<1x32xf32> to vector<32xf32>
    %153 = vector.shape_cast %149 : vector<32xf32> to vector<1x32xf32>
    tpu.vector_store %arg3[%150, %c32_64], %153 {strides = array<i32>} : memref<4x128xf32, #tpu.memory_space<vmem>>, vector<1x32xf32>,
    %c4_i32_65 = arith.constant 4 : i32
    %154 = arith.muli %c3_i32_54, %c4_i32_65 : i32
    %c2_i32_66 = arith.constant 2 : i32
    %155 = arith.addi %154, %c2_i32_66 : i32
    %c0_67 = arith.constant 0 : index
    %156 = arith.index_cast %155 : i32 to index
    %157 = memref.load %arg1[%c0_67, %156] : memref<1x16xi32, #tpu.memory_space<smem>>
    %158 = arith.index_cast %157 : i32 to index
    %c0_68 = arith.constant 0 : index
    %159 = vector.load %arg2[%158, %c0_68] : memref<16x32xf32, #tpu.memory_space<vmem>>, vector<1x32xf32>
    %160 = vector.shape_cast %159 : vector<1x32xf32> to vector<32xf32>
    %161 = arith.index_cast %c3_i32_54 : i32 to index
    %c64_69 = arith.constant 64 : index
    %162 = vector.load %arg3[%161, %c64_69] : memref<4x128xf32, #tpu.memory_space<vmem>>, vector<1x32xf32>
    %163 = vector.shape_cast %162 : vector<1x32xf32> to vector<32xf32>
    %164 = vector.shape_cast %160 : vector<32xf32> to vector<1x32xf32>
    tpu.vector_store %arg3[%161, %c64_69], %164 {strides = array<i32>} : memref<4x128xf32, #tpu.memory_space<vmem>>, vector<1x32xf32>,
    %c4_i32_70 = arith.constant 4 : i32
    %165 = arith.muli %c3_i32_54, %c4_i32_70 : i32
    %c3_i32_71 = arith.constant 3 : i32
    %166 = arith.addi %165, %c3_i32_71 : i32
    %c0_72 = arith.constant 0 : index
    %167 = arith.index_cast %166 : i32 to index
    %168 = memref.load %arg1[%c0_72, %167] : memref<1x16xi32, #tpu.memory_space<smem>>
    %169 = arith.index_cast %168 : i32 to index
    %c0_73 = arith.constant 0 : index
    %170 = vector.load %arg2[%169, %c0_73] : memref<16x32xf32, #tpu.memory_space<vmem>>, vector<1x32xf32>
    %171 = vector.shape_cast %170 : vector<1x32xf32> to vector<32xf32>
    %172 = arith.index_cast %c3_i32_54 : i32 to index
    %c96_74 = arith.constant 96 : index
    %173 = vector.load %arg3[%172, %c96_74] : memref<4x128xf32, #tpu.memory_space<vmem>>, vector<1x32xf32>
    %174 = vector.shape_cast %173 : vector<1x32xf32> to vector<32xf32>
    %175 = vector.shape_cast %171 : vector<32xf32> to vector<1x32xf32>
    tpu.vector_store %arg3[%172, %c96_74], %175 {strides = array<i32>} : memref<4x128xf32, #tpu.memory_space<vmem>>, vector<1x32xf32>,
    %c4_i32_75 = arith.constant 4 : i32
    return
  }
  func.func @transform_0(%arg0: i32) -> (i32, i32) {
    %c0_i32 = arith.constant 0 : i32
    %c0_i32_0 = arith.constant 0 : i32
    return %arg0, %c0_i32 : i32, i32
  }
  func.func @transform_1(%arg0: i32) -> (i32, i32) {
    %c0_i32 = arith.constant 0 : i32
    %c0_i32_0 = arith.constant 0 : i32
    %c0_i32_1 = arith.constant 0 : i32
    return %c0_i32, %c0_i32_0 : i32, i32
  }
  func.func @transform_2(%arg0: i32) -> (i32, i32) {
    %c0_i32 = arith.constant 0 : i32
    %c0_i32_0 = arith.constant 0 : i32
    return %arg0, %c0_i32 : i32, i32
  }
}

</mosaic_0001>

<bundles_post_ra>
// kernel: token_embedding.1
= control target key start
LH: loop header
LB: loop body
LE: loop exit
PB: predicated region body
PF: predicated region fallthrough
CT: control target
= control target key end

     0   :  { %7 = vsyncpa [#allocation4], 0  ;;  %s332_s0 = inlined_call_operand.vmem [shape: s32[1,16], index: 0, kind: input, shape index: {}]   ;;  %s333_s1 = inlined_call_operand.hbm [shape: f32[16,32], index: 1, kind: input, shape index: {}]   ;;  %s334_s2 = inlined_call_operand.vmem [shape: f32[4,128], index: 2, kind: output, shape index: {}]  }
   0x1   :  { %s15_s11 = sshll.u32 %s332_s0, 4  ;;  %s16_s11 = int_to_ptr.vmem [resolvable:$true] %s15_s11 }
   0x2   :  { %8 = vsyncpa [#allocation3], 0  ;;  %s198_s12 = scalar_lea.vmem %s16_s11, 16  ;;  %p203_p1 = scmp.lt.s32.totalorder %s16_s11, %s16_s11 }
   0x3   :  { %p199_p0 = scmp.ne.s32.totalorder %s16_s11, %s198_s12  ;;  %p204_p2 = scmp.lt.s32.totalorder %s198_s12, %s198_s12 }
   0x5   :  { %p205_p3 = por %p204_p2, %p203_p1 }
   0x7   :  { %p206_p4 = pnand %p205_p3, %p199_p0 }
   0x9   :  { %209 = shalt.err (!%p206_p4)
}
   0xa   :  { %s234_s13 = smov [#allocation2]   ;;  %s235_s14 = smov [#allocation5]  }
   0xb   :  { %18 = dma.vmem_to_smem %s16_s11, 16, %s234_s13, [#allocation4]  }
   0xc   :  { %s24_s15 = sshll.u32 %s235_s14, 4  ;;  %s25_s15 = int_to_ptr.vmem [resolvable:$true] %s24_s15 }
   0xd   :  { %s218_s16 = scalar_lea.vmem %s25_s15, 256  ;;  %p223_p6 = scmp.lt.s32.totalorder %s25_s15, %s25_s15 }
   0xe   :  { %p219_p5 = scmp.ne.s32.totalorder %s25_s15, %s218_s16  ;;  %p224_p7 = scmp.lt.s32.totalorder %s218_s16, %s218_s16 }
  0x10   :  { %p225_p8 = por %p224_p7, %p223_p6 }
  0x12   :  { %p226_p9 = pnand %p225_p8, %p219_p5 }
  0x14   :  { %229 = shalt.err (!%p226_p9)
}
  0x15   :  { %s236_s0 = smov 128   ;;  %s237_s17 = smov 8  }
  0x16   :  { %30 = dma.hbm_to_vmem [thread:$0]  %s333_s1, 256, %s25_s15, [#allocation3], %s236_s0, %s236_s0, %s237_s17  }
  0x17   :  { %230 = dma.done.wait [#allocation4], 16  }
  0x18   :  { %231 = vsyncadd [#allocation4], 4294967280 }
  0x19   :  { %232 = dma.done.wait [#allocation3], 256  }
  0x1a   :  { %233 = vsyncadd [#allocation3], 4294967040 }
  0x1b   :  { %37 = sfence }
  0x1c   :  { %s184_s20 = sld [smem:[#allocation2 + $0x9]]  ;;  %s238_s29 = smov 32   ;;  %vm41_vm0 = vcmask 253952   ;;  %vm50_vm1 = vcmask 516352   ;;  %vm59_vm2 = vcmask 778752   ;;  %vm68_vm3 = vcmask 1041152  }
  0x1d   :  { %s176_s21 = sld [smem:[#allocation2 + $0x1]]  ;;  %s239_s14 = smov 64  }
  0x1e   :  { %s188_s22 = sld [smem:[#allocation2 + $0xd]] }
  0x1f   :  { %s180_s23 = sld [smem:[#allocation2 + $0x5]] }
  0x20   :  { %s181_s24 = sld [smem:[#allocation2 + $0x6]] }
  0x21   :  { %s177_s25 = sld [smem:[#allocation2 + $0x2]] }
  0x22   :  { %s262_s26 = sld [smem:[#allocation2 + $0xe]]  ;;  %s103_s27 = scalar_lea.vmem [#allocation5], %s184_s20 }
  0x23   :  { %v104_v0 = vld [vmem:[%s103_s27] sm:$0x1]  ;;  %s264_s28 = sld [smem:[#allocation2 + $0xa]]  ;;  %s44_s1 = scalar_lea.vmem [#allocation5], %s176_s21 }
  0x24   :  { %106 = vrot.lane.b32.xlu1 %v104_v0, %s238_s29  ;;  %v45_v1 = vld [vmem:[%s44_s1] sm:$0x1]  ;;  %s266_s30 = sld [smem:[#allocation2 + $0x7]]  ;;  %s131_s3 = scalar_lea.vmem [#allocation5], %s188_s22 }
  0x25   :  { %47 = vrot.lane.b32.xlu0 %v45_v1, %s238_s29  ;;  %v132_v2 = vld [vmem:[%s131_s3] sm:$0x1]  ;;  %s268_s4 = sld [smem:[#allocation2 + $0x3]]  ;;  %s75_s5 = scalar_lea.vmem [#allocation5], %s180_s23 }
  0x26   :  { %v76_v3 = vld [vmem:[%s75_s5] sm:$0x1]  ;;  %s270_s6 = sld [smem:[#allocation2 + $0xf]]  ;;  %s83_s9 = scalar_lea.vmem [#allocation5], %s181_s24 }
  0x27   :  { %s272_s7 = sld [smem:[#allocation2 + $0xb]]  ;;  %v84_v4 = vld [vmem:[%s83_s9] sm:$0x1]  ;;  %s53_s11 = scalar_lea.vmem [#allocation5], %s177_s25 }
  0x28   :  { %134 = vrot.lane.b32.xlu1 %v132_v2, %s238_s29  ;;  %s183_s8 = sld [smem:[#allocation2 + $0x8]]  ;;  %v54_v5 = vld [vmem:[%s53_s11] sm:$0x1]  ;;  %s139_s15 = scalar_lea.vmem [#allocation5], %s262_s26 }
  0x29   :  { %78 = vrot.lane.b32.xlu0 %v76_v3, %s238_s29  ;;  %s38_s10 = sld [smem:[#allocation2]]  ;;  %v140_v6 = vld [vmem:[%s139_s15] sm:$0x1]  ;;  %s111_s16 = scalar_lea.vmem [#allocation5], %s264_s28 }
  0x2a   :  { %s187_s12 = sld [smem:[#allocation2 + $0xc]]  ;;  %v112_v7 = vld [vmem:[%s111_s16] sm:$0x1]  ;;  %s91_s20 = scalar_lea.vmem [#allocation5], %s266_s30 }
  0x2b   :  { %s179_s13 = sld [smem:[#allocation2 + $0x4]]  ;;  %v92_v10 = vld [vmem:[%s91_s20] sm:$0x1]  ;;  %s62_s24 = scalar_lea.vmem [#allocation5], %s268_s4 }
  0x2c   :  { %86 = vrot.lane.b32.xlu1 %v84_v4, %s239_s14  ;;  %v63_v12 = vld [vmem:[%s62_s24] sm:$0x1]  ;;  %s240_s1 = smov 96   ;;  %s147_s30 = scalar_lea.vmem [#allocation5], %s270_s6 }
  0x2d   :  { %56 = vrot.lane.b32.xlu0 %v54_v5, %s239_s14  ;;  %v148_v14 = vld [vmem:[%s147_s30] sm:$0x1]  ;;  %s119_s3 = scalar_lea.vmem [#allocation5], %s272_s7 }
  0x2e   :  { %s99_s0 = scalar_lea.vmem [#allocation5], %s183_s8  ;;  %v120_v15 = vld [vmem:[%s119_s3] sm:$0x1] }
  0x2f   :  { %v100_v8 = vld [vmem:[%s99_s0] sm:$0x1]  ;;  %s39_s19 = scalar_lea.vmem [#allocation5], %s38_s10 }
  0x30   :  { %142 = vrot.lane.b32.xlu1 %v140_v6, %s239_s14  ;;  %101 = vst.msk [vmem:[%s334_s2 + $0x2] sm:$0x1] %vm41_vm0, %v100_v8  ;;  %v40_v9 = vld [vmem:[%s39_s19] sm:$0x1]  ;;  %s127_s23 = scalar_lea.vmem [#allocation5], %s187_s12 }
  0x31   :  { %114 = vrot.lane.b32.xlu0 %v112_v7, %s239_s14  ;;  %42 = vst.msk [vmem:[%s334_s2] sm:$0x1] %vm41_vm0, %v40_v9  ;;  %v128_v11 = vld [vmem:[%s127_s23] sm:$0x1]  ;;  %s71_s27 = scalar_lea.vmem [#allocation5], %s179_s13 }
  0x32   :  { %129 = vst.msk [vmem:[%s334_s2 + $0x3] sm:$0x1] %vm41_vm0, %v128_v11  ;;  %v72_v13 = vld [vmem:[%s71_s27] sm:$0x1] }
  0x33   :  { %73 = vst.msk [vmem:[%s334_s2 + $0x1] sm:$0x1] %vm41_vm0, %v72_v13 }
  0x34   :  { %94 = vrot.lane.b32.xlu1 %v92_v10, %s240_s1 }
  0x35   :  { %65 = vrot.lane.b32.xlu0 %v63_v12, %s240_s1 }
  0x38   :  { %150 = vrot.lane.b32.xlu1 %v148_v14, %s240_s1 }
  0x39   :  { %122 = vrot.lane.b32.xlu0 %v120_v15, %s240_s1 }
  0x96   :  { %v107_v16 = vpop.permute.xlu1 %106 }
  0x97   :  { %109 = vst.msk [vmem:[%s334_s2 + $0x2] sm:$0x1] %vm50_vm1, %v107_v16  ;;  %v48_v17 = vpop.permute.xlu0 %47 }
  0x98   :  { %51 = vst.msk [vmem:[%s334_s2] sm:$0x1] %vm50_vm1, %v48_v17 }
  0x9a   :  { %v135_v18 = vpop.permute.xlu1 %134 }
  0x9b   :  { %137 = vst.msk [vmem:[%s334_s2 + $0x3] sm:$0x1] %vm50_vm1, %v135_v18  ;;  %v79_v19 = vpop.permute.xlu0 %78 }
  0x9c   :  { %81 = vst.msk [vmem:[%s334_s2 + $0x1] sm:$0x1] %vm50_vm1, %v79_v19 }
  0x9e   :  { %v87_v20 = vpop.permute.xlu1 %86 }
  0x9f   :  { %89 = vst.msk [vmem:[%s334_s2 + $0x1] sm:$0x1] %vm59_vm2, %v87_v20  ;;  %v57_v21 = vpop.permute.xlu0 %56 }
  0xa0   :  { %60 = vst.msk [vmem:[%s334_s2] sm:$0x1] %vm59_vm2, %v57_v21 }
  0xa2   :  { %v143_v22 = vpop.permute.xlu1 %142 }
  0xa3   :  { %145 = vst.msk [vmem:[%s334_s2 + $0x3] sm:$0x1] %vm59_vm2, %v143_v22  ;;  %v115_v23 = vpop.permute.xlu0 %114 }
  0xa4   :  { %117 = vst.msk [vmem:[%s334_s2 + $0x2] sm:$0x1] %vm59_vm2, %v115_v23 }
  0xa6   :  { %v95_v24 = vpop.permute.xlu1 %94 }
  0xa7   :  { %97 = vst.msk [vmem:[%s334_s2 + $0x1] sm:$0x1] %vm68_vm3, %v95_v24  ;;  %v66_v25 = vpop.permute.xlu0 %65 }
  0xa8   :  { %69 = vst.msk [vmem:[%s334_s2] sm:$0x1] %vm68_vm3, %v66_v25 }
  0xaa   :  { %v151_v26 = vpop.permute.xlu1 %150 }
  0xab   :  { %153 = vst.msk [vmem:[%s334_s2 + $0x3] sm:$0x1] %vm68_vm3, %v151_v26  ;;  %v123_v27 = vpop.permute.xlu0 %122 }
  0xac   :  { %125 = vst.msk [vmem:[%s334_s2 + $0x2] sm:$0x1] %vm68_vm3, %v123_v27 }
  0xad   :  { %158 = vsyncpa [#allocation3], 1 }
  0xae   :  { %159 = vsyncpa [#allocation4], 1 }

</bundles_post_ra>
